<compile_context>
chip_gen: v7x
topology: tpu7x:2x2x1
jax: 0.10.0
libtpu: 0.0.40
codegen_flags: <defaults>
</compile_context>

<pallas_src>
import functools

import jax
import jax.numpy as jnp
from jax.experimental import pallas as pl
from jax.experimental.pallas import tpu as pltpu


def _attn_kernel(emb_ref, w_ref, ctx_ref, alpha_ref, k_cache, v_cache, *,
                 inv_scaling, tq, flatten_ctx, flatten_alpha):
    bt, s_kv, h = emb_ref.shape
    emb_dtype = emb_ref.dtype
    qi = pl.program_id(1)

    # K/V projections once per batch tile. The query axis is "arbitrary" (sequential), so the
    # scratch cache written at q-tile 0 stays valid for all following q-tiles of this batch
    # tile. Cached in the embedding dtype so the attention matmuls run at native MXU rate.
    @pl.when(qi == 0)
    def _():
        x2 = emb_ref[...].reshape(bt * s_kv, h)
        kf = jnp.dot(x2, w_ref[1], preferred_element_type=jnp.float32)
        vf = jnp.dot(x2, w_ref[2], preferred_element_type=jnp.float32)
        k_cache[...] = kf.reshape(bt, s_kv, h).astype(emb_dtype)
        v_cache[...] = vf.reshape(bt, s_kv, h).astype(emb_dtype)

    # Q projection for this query slab only.
    if tq == s_kv:
        xq = emb_ref[...]
    else:
        row0 = pl.multiple_of(qi * tq, tq)
        xq = emb_ref[:, pl.ds(row0, tq), :]
    qf = jnp.dot(xq.reshape(bt * tq, h), w_ref[0], preferred_element_type=jnp.float32)
    q = qf.reshape(bt, tq, h).astype(emb_dtype)            # native-dtype MXU operand

    # scores = Q K^T / sqrt(H); contraction over the feature dim, f32 accumulation.
    scores = jnp.einsum("bqd,bkd->bqk", q, k_cache[...],
                        preferred_element_type=jnp.float32) * inv_scaling   # (bt, tq, S) f32

    # Numerically-stabilized softmax over keys (f32). Exact reciprocal: alphas is an output.
    scores = scores - jnp.max(scores, axis=-1, keepdims=True)
    e = jnp.exp(scores)
    alphas = e * pl.reciprocal(jnp.sum(e, axis=-1, keepdims=True))          # exact

    # context = alphas @ V with native-dtype operands, f32 accumulation.
    context = jnp.einsum("bqk,bkd->bqd", alphas.astype(emb_dtype), v_cache[...],
                         preferred_element_type=jnp.float32)                # (bt, tq, H) f32

    if flatten_ctx:
        ctx_ref[...] = context.reshape(bt, tq * h).astype(ctx_ref.dtype)
    else:
        ctx_ref[...] = context.astype(ctx_ref.dtype)
    if flatten_alpha:
        alpha_ref[...] = alphas.reshape(bt, tq * s_kv).astype(alpha_ref.dtype)
    else:
        alpha_ref[...] = alphas.astype(alpha_ref.dtype)


def _tpu_vmem_and_cores():
    """Physical VMEM bytes per TensorCore and TC count (safe defaults if the query fails)."""
    vmem_bytes = 128 * 1024 * 1024
    num_cores = 1
    try:
        info = pltpu.get_tpu_info()
        vmem_bytes = int(getattr(info, "vmem_capacity_bytes", vmem_bytes))
        cores = None
        for name in ("tensorcore_count", "num_tensorcores", "core_count"):
            val = getattr(info, name, None)
            if val:
                cores = int(val)
                break
        if cores is None:
            # Heuristic: 64 MiB/TC => v7x (2 TensorCores/chip); 128 MiB => v5e/v6e (1 TC).
            cores = 2 if vmem_bytes <= 64 * 1024 * 1024 else 1
        num_cores = cores
    except Exception:
        pass
    return vmem_bytes, num_cores


def _select_tiles(B, S, H, emb_dtype, out_dtype, vmem_budget_bytes, num_cores):
    """Pick (bt, tq): batch-tile and query-tile sizes.

    Priorities: (1) MXU M-dim fill (target >= 256 rows for the attention matmuls),
    (2) at least `num_cores` grid steps so megacore sharding has work (only matters on v7x),
    (3) fewest grid steps (~0.35 us fixed overhead each), (4) largest tile.
    Every candidate is checked against a VMEM budget that includes the double-buffered I/O
    blocks, the single-buffered K/V scratch cache, and the in-kernel f32 temporaries.
    """
    emb_b = jnp.dtype(emb_dtype).itemsize
    out_b = jnp.dtype(out_dtype).itemsize

    def vmem_needed(bt, tq):
        io_blocks = 2 * (bt * S * H * emb_b        # embedding block (resident across q)
                         + 3 * H * H * emb_b       # stacked weights (replicated)
                         + bt * tq * H * out_b     # context block
                         + bt * tq * S * out_b)    # alphas block
        kv_scratch = 2 * bt * S * H * emb_b        # K + V cache (single-buffered)
        f32_tmp = 4 * (2 * bt * S * H              # k/v projections before cast
                       + 2 * bt * tq * H           # q projection + f32 context
                       + 3 * bt * tq * S)          # scores / exp / alphas
        return io_blocks + kv_scratch + f32_tmp

    best, best_key = None, None
    for bt in range(1, B + 1):
        if B % bt:
            continue
        for tq in range(1, S + 1):
            if S % tq or (tq != S and tq % 8 != 0):   # keep query slabs sublane-aligned
                continue
            if vmem_needed(bt, tq) > vmem_budget_bytes:
                continue
            steps = (B // bt) * (S // tq)
            key = (min(bt * tq, 256),                 # fill MXU rows (2x256 array on v6e/v7x)
                   1 if steps >= num_cores else 0,    # keep every TensorCore busy (v7x)
                   -steps,                            # then fewest grid steps
                   bt * tq)
            if best_key is None or key > best_key:
                best, best_key = (bt, tq), key
    if best is None:
        best = (1, 8 if S % 8 == 0 else S)            # degenerate fallback
    return best


def causal_self_attention(embedding, wq, wk, wv):
    """embedding: [B, S, H]; wq/wk/wv: [H, H] in PyTorch Linear layout [out, in]."""
    B, S, H = embedding.shape
    emb_dtype = embedding.dtype
    out_dtype = emb_dtype
    inv_scaling = 1.0 / (float(H) ** 0.5)

    # nn.Linear computes x @ W^T: stack the transposed weights as (3, H, H) = [Wq^T, Wk^T, Wv^T]
    # so the kernel indexes the cheap leading axis (no lane-misaligned qkv split for H % 128 != 0).
    w_stacked = jnp.stack([wq.T, wk.T, wv.T], axis=0)

    vmem_capacity, num_cores = _tpu_vmem_and_cores()
    vmem_limit = (vmem_capacity * 3) // 4             # ~25% headroom for Mosaic internal scratch
    bt, tq = _select_tiles(B, S, H, emb_dtype, out_dtype,
                           vmem_budget_bytes=int(vmem_limit * 0.8),
                           num_cores=num_cores)

    # Lane-dense output stores: flatten the trailing (rows, features) dims whenever the
    # flattened width is a 128-lane multiple and the batch tile keeps the 2-D block legal.
    tile_ok = (bt == B) or (bt % 8 == 0)
    flatten_ctx = tile_ok and H < 128 and ((tq * H) % 128 == 0)
    flatten_alpha = tile_ok and S < 128 and ((tq * S) % 128 == 0)

    def _run(flat_ctx, flat_alpha):
        if flat_ctx:
            ctx_shape = (B, S * H)
            ctx_spec = pl.BlockSpec((bt, tq * H), lambda b, q: (b, q))
        else:
            ctx_shape = (B, S, H)
            ctx_spec = pl.BlockSpec((bt, tq, H), lambda b, q: (b, q, 0))
        if flat_alpha:
            al_shape = (B, S * S)
            al_spec = pl.BlockSpec((bt, tq * S), lambda b, q: (b, q))
        else:
            al_shape = (B, S, S)
            al_spec = pl.BlockSpec((bt, tq, S), lambda b, q: (b, q, 0))

        kernel = functools.partial(_attn_kernel, inv_scaling=inv_scaling, tq=tq,
                                   flatten_ctx=flat_ctx, flatten_alpha=flat_alpha)

        grid_spec = pltpu.PrefetchScalarGridSpec(
            num_scalar_prefetch=0,
            grid=(B // bt, S // tq),
            in_specs=[
                pl.BlockSpec((bt, S, H), lambda b, q: (b, 0, 0)),   # embedding (resident over q)
                pl.BlockSpec((3, H, H), lambda b, q: (0, 0, 0)),    # stacked Wq^T/Wk^T/Wv^T
            ],
            out_specs=[ctx_spec, al_spec],
            scratch_shapes=[
                pltpu.VMEM((bt, S, H), emb_dtype),   # K cache (native dtype -> bf16-rate MXU)
                pltpu.VMEM((bt, S, H), emb_dtype),   # V cache
            ],
        )

        ctx, al = pl.pallas_call(
            kernel,
            out_shape=(jax.ShapeDtypeStruct(ctx_shape, out_dtype),
                       jax.ShapeDtypeStruct(al_shape, out_dtype)),
            grid_spec=grid_spec,
            compiler_params=pltpu.CompilerParams(
                # Batch tiles are independent (megacore-shardable); the query axis must stay
                # sequential so the K/V scratch cache written at q == 0 remains valid.
                dimension_semantics=("parallel", "arbitrary"),
                vmem_limit_bytes=int(vmem_limit),
            ),
        )(embedding, w_stacked)

        if flat_ctx:
            ctx = ctx.reshape(B, S, H)
        if flat_alpha:
            al = al.reshape(B, S, S)
        return ctx, al

    try:
        return _run(flatten_ctx, flatten_alpha)
    except Exception:
        # The lane-dense (flattened) store needs an in-kernel minor-dim relayout; if Mosaic
        # rejects that reshape on this jax version, fall back to plain 3-D output blocks.
        if flatten_ctx or flatten_alpha:
            return _run(False, False)
        raise


def _reference(embedding, wq, wk, wv):
    H = embedding.shape[-1]
    q = jnp.einsum("bsh,oh->bso", embedding, wq)
    k = jnp.einsum("bsh,oh->bso", embedding, wk)
    v = jnp.einsum("bsh,oh->bso", embedding, wv)
    scores = jnp.einsum("bqd,bkd->bqk", q, k) / jnp.sqrt(jnp.float32(H))
    alphas = jax.nn.softmax(scores, axis=-1)
    context = jnp.einsum("bqk,bkd->bqd", alphas, v)
    return context, alphas


if __name__ == "__main__":
    B, S, H = 2, 8, 32

    key = jax.random.PRNGKey(0)
    k_emb, k_q, k_k, k_v = jax.random.split(key, 4)

    embedding = jax.random.normal(k_emb, (B, S, H), dtype=jnp.float32)
    # Deterministic Linear weights (shape [out_features, in_features], bias=False).
    bound = 1.0 / (float(H) ** 0.5)
    wq = jax.random.uniform(k_q, (H, H), jnp.float32, -bound, bound)
    wk = jax.random.uniform(k_k, (H, H), jnp.float32, -bound, bound)
    wv = jax.random.uniform(k_v, (H, H), jnp.float32, -bound, bound)

    context, alphas = causal_self_attention(embedding, wq, wk, wv)
    jax.block_until_ready((context, alphas))

    ref_ctx, ref_alphas = _reference(embedding, wq, wk, wv)
    # Tolerance covers MXU default-precision / accumulation-order differences.
    assert jnp.allclose(context, ref_ctx, atol=2e-3, rtol=2e-3)
    assert jnp.allclose(alphas, ref_alphas, atol=2e-3, rtol=2e-3)
    # Sanity: softmax rows sum to 1 (exact reciprocal path).
    assert jnp.allclose(jnp.sum(alphas, axis=-1), 1.0, atol=1e-3)

    print("KERNEL_OK")
</pallas_src>

<mosaic_0001>
module attributes {stable_mosaic.version = 11 : i64} {
  func.func @_attn_kernel(%arg0: i32, %arg1: i32, %arg2: memref<2x8x32xf32, #tpu.memory_space<vmem>>, %arg3: memref<3x32x32xf32, #tpu.memory_space<vmem>>, %arg4: memref<2x256xf32, #tpu.memory_space<vmem>>, %arg5: memref<2x8x8xf32, #tpu.memory_space<vmem>>, %arg6: memref<2x8x32xf32, #tpu.memory_space<vmem>>, %arg7: memref<2x8x32xf32, #tpu.memory_space<vmem>>) attributes {dimension_semantics = [#tpu.dimension_semantics<parallel>, #tpu.dimension_semantics<arbitrary>], iteration_bounds = array<i64: 1, 1>, scalar_prefetch = 0 : i64, scratch_operands = 2 : i64, tpu.core_type = #tpu.core_type<tc>, window_params = [{transform_indices = @transform_0, window_bounds = array<i64: 2, 8, 32>}, {pipeline_mode = #tpu.pipeline_mode<synchronous>, transform_indices = @transform_1, window_bounds = array<i64: 3, 32, 32>}, {transform_indices = @transform_2, window_bounds = array<i64: 2, 256>}, {transform_indices = @transform_3, window_bounds = array<i64: 2, 8, 8>}]} {
    %c0_i32 = arith.constant 0 : i32
    %0 = arith.cmpi eq, %arg1, %c0_i32 : i32
    %1 = arith.extui %0 : i1 to i32
    %c0_i32_0 = arith.constant 0 : i32
    %2 = arith.cmpi ne, %1, %c0_i32_0 : i32
    scf.if %2 {
      %c0_22 = arith.constant 0 : index
      %c0_23 = arith.constant 0 : index
      %c0_24 = arith.constant 0 : index
      %28 = vector.load %arg2[%c0_22, %c0_23, %c0_24] : memref<2x8x32xf32, #tpu.memory_space<vmem>>, vector<2x8x32xf32>
      %29 = vector.shape_cast %28 : vector<2x8x32xf32> to vector<16x32xf32>
      %c1 = arith.constant 1 : index
      %c0_25 = arith.constant 0 : index
      %c0_26 = arith.constant 0 : index
      %30 = vector.load %arg3[%c1, %c0_25, %c0_26] : memref<3x32x32xf32, #tpu.memory_space<vmem>>, vector<1x32x32xf32>
      %31 = vector.shape_cast %30 : vector<1x32x32xf32> to vector<32x32xf32>
      %cst_27 = arith.constant dense<0.000000e+00> : vector<16x32xf32>
      %32 = tpu.matmul %29, %31, %cst_27 {dimension_numbers = #tpu.dot_dimension_numbers<[1], [0], [0], [1], [0, 0, 1, 1], [], []>} : vector<16x32xf32>, vector<32x32xf32>, vector<16x32xf32> -> vector<16x32xf32>
      %c2 = arith.constant 2 : index
      %c0_28 = arith.constant 0 : index
      %c0_29 = arith.constant 0 : index
      %33 = vector.load %arg3[%c2, %c0_28, %c0_29] : memref<3x32x32xf32, #tpu.memory_space<vmem>>, vector<1x32x32xf32>
      %34 = vector.shape_cast %33 : vector<1x32x32xf32> to vector<32x32xf32>
      %cst_30 = arith.constant dense<0.000000e+00> : vector<16x32xf32>
      %35 = tpu.matmul %29, %34, %cst_30 {dimension_numbers = #tpu.dot_dimension_numbers<[1], [0], [0], [1], [0, 0, 1, 1], [], []>} : vector<16x32xf32>, vector<32x32xf32>, vector<16x32xf32> -> vector<16x32xf32>
      %36 = vector.shape_cast %32 : vector<16x32xf32> to vector<2x8x32xf32>
      %c0_31 = arith.constant 0 : index
      %c0_32 = arith.constant 0 : index
      %c0_33 = arith.constant 0 : index
      %37 = vector.load %arg6[%c0_31, %c0_32, %c0_33] : memref<2x8x32xf32, #tpu.memory_space<vmem>>, vector<2x8x32xf32>
      tpu.vector_store %arg6[%c0_31, %c0_32, %c0_33], %36 {strides = array<i32>} : memref<2x8x32xf32, #tpu.memory_space<vmem>>, vector<2x8x32xf32>,
      %38 = vector.shape_cast %35 : vector<16x32xf32> to vector<2x8x32xf32>
      %c0_34 = arith.constant 0 : index
      %c0_35 = arith.constant 0 : index
      %c0_36 = arith.constant 0 : index
      %39 = vector.load %arg7[%c0_34, %c0_35, %c0_36] : memref<2x8x32xf32, #tpu.memory_space<vmem>>, vector<2x8x32xf32>
      tpu.vector_store %arg7[%c0_34, %c0_35, %c0_36], %38 {strides = array<i32>} : memref<2x8x32xf32, #tpu.memory_space<vmem>>, vector<2x8x32xf32>,
    } else {
    }
    %c0 = arith.constant 0 : index
    %c0_1 = arith.constant 0 : index
    %c0_2 = arith.constant 0 : index
    %3 = vector.load %arg2[%c0, %c0_1, %c0_2] : memref<2x8x32xf32, #tpu.memory_space<vmem>>, vector<2x8x32xf32>
    %4 = vector.shape_cast %3 : vector<2x8x32xf32> to vector<16x32xf32>
    %c0_3 = arith.constant 0 : index
    %c0_4 = arith.constant 0 : index
    %c0_5 = arith.constant 0 : index
    %5 = vector.load %arg3[%c0_3, %c0_4, %c0_5] : memref<3x32x32xf32, #tpu.memory_space<vmem>>, vector<1x32x32xf32>
    %6 = vector.shape_cast %5 : vector<1x32x32xf32> to vector<32x32xf32>
    %cst = arith.constant dense<0.000000e+00> : vector<16x32xf32>
    %7 = tpu.matmul %4, %6, %cst {dimension_numbers = #tpu.dot_dimension_numbers<[1], [0], [0], [1], [0, 0, 1, 1], [], []>} : vector<16x32xf32>, vector<32x32xf32>, vector<16x32xf32> -> vector<16x32xf32>
    %8 = vector.shape_cast %7 : vector<16x32xf32> to vector<2x8x32xf32>
    %c0_6 = arith.constant 0 : index
    %c0_7 = arith.constant 0 : index
    %c0_8 = arith.constant 0 : index
    %9 = vector.load %arg6[%c0_6, %c0_7, %c0_8] : memref<2x8x32xf32, #tpu.memory_space<vmem>>, vector<2x8x32xf32>
    "tpu.trace_start"() <{level = 10 : i32, message = "bqd,bkd->bqk"}> : () -> ()
    %cst_9 = arith.constant dense<0.000000e+00> : vector<2x8x8xf32>
    %10 = tpu.matmul %8, %9, %cst_9 {dimension_numbers = #tpu.dot_dimension_numbers<[2], [2], [1], [1], [0, 0, 0, 1, 1, 1], [0], [0]>} : vector<2x8x32xf32>, vector<2x8x32xf32>, vector<2x8x8xf32> -> vector<2x8x8xf32>
    "tpu.trace_stop"() : () -> ()
    %cst_10 = arith.constant 0.176776692 : f32
    %11 = vector.broadcast %cst_10 : f32 to vector<2x8x8xf32>
    %12 = arith.mulf %10, %11 : vector<2x8x8xf32>
    %cst_11 = arith.constant dense<0xFF800000> : vector<2x8xf32>
    %13 = vector.multi_reduction <maximumf>, %12, %cst_11 [2] : vector<2x8x8xf32> to vector<2x8xf32>
    %14 = vector.shape_cast %13 : vector<2x8xf32> to vector<2x8x1xf32>
    %15 = vector.broadcast %14 : vector<2x8x1xf32> to vector<2x8x8xf32>
    %16 = arith.subf %12, %15 : vector<2x8x8xf32>
    %17 = math.exp %16 : vector<2x8x8xf32>
    %cst_12 = arith.constant dense<0.000000e+00> : vector<2x8xf32>
    %18 = vector.multi_reduction <add>, %17, %cst_12 [2] : vector<2x8x8xf32> to vector<2x8xf32>
    %19 = vector.shape_cast %18 : vector<2x8xf32> to vector<2x8x1xf32>
    %20 = tpu.reciprocal %19 : vector<2x8x1xf32> -> vector<2x8x1xf32>
    %21 = vector.broadcast %20 : vector<2x8x1xf32> to vector<2x8x8xf32>
    %22 = arith.mulf %17, %21 : vector<2x8x8xf32>
    %c0_13 = arith.constant 0 : index
    %c0_14 = arith.constant 0 : index
    %c0_15 = arith.constant 0 : index
    %23 = vector.load %arg7[%c0_13, %c0_14, %c0_15] : memref<2x8x32xf32, #tpu.memory_space<vmem>>, vector<2x8x32xf32>
    "tpu.trace_start"() <{level = 10 : i32, message = "bqk,bkd->bqd"}> : () -> ()
    %cst_16 = arith.constant dense<0.000000e+00> : vector<2x8x32xf32>
    %24 = tpu.matmul %22, %23, %cst_16 {dimension_numbers = #tpu.dot_dimension_numbers<[2], [1], [1], [2], [0, 0, 0, 1, 1, 2], [0], [0]>} : vector<2x8x8xf32>, vector<2x8x32xf32>, vector<2x8x32xf32> -> vector<2x8x32xf32>
    "tpu.trace_stop"() : () -> ()
    %25 = vector.shape_cast %24 : vector<2x8x32xf32> to vector<2x256xf32>
    %c0_17 = arith.constant 0 : index
    %c0_18 = arith.constant 0 : index
    %26 = vector.load %arg4[%c0_17, %c0_18] : memref<2x256xf32, #tpu.memory_space<vmem>>, vector<2x256xf32>
    tpu.vector_store %arg4[%c0_17, %c0_18], %25 {strides = array<i32>} : memref<2x256xf32, #tpu.memory_space<vmem>>, vector<2x256xf32>,
    %c0_19 = arith.constant 0 : index
    %c0_20 = arith.constant 0 : index
    %c0_21 = arith.constant 0 : index
    %27 = vector.load %arg5[%c0_19, %c0_20, %c0_21] : memref<2x8x8xf32, #tpu.memory_space<vmem>>, vector<2x8x8xf32>
    tpu.vector_store %arg5[%c0_19, %c0_20, %c0_21], %22 {strides = array<i32>} : memref<2x8x8xf32, #tpu.memory_space<vmem>>, vector<2x8x8xf32>,
    return
  }
  func.func @transform_0(%arg0: i32, %arg1: i32) -> (i32, i32, i32) {
    %c0_i32 = arith.constant 0 : i32
    %c0_i32_0 = arith.constant 0 : i32
    %c0_i32_1 = arith.constant 0 : i32
    return %arg0, %c0_i32, %c0_i32_0 : i32, i32, i32
  }
  func.func @transform_1(%arg0: i32, %arg1: i32) -> (i32, i32, i32) {
    %c0_i32 = arith.constant 0 : i32
    %c0_i32_0 = arith.constant 0 : i32
    %c0_i32_1 = arith.constant 0 : i32
    %c0_i32_2 = arith.constant 0 : i32
    return %c0_i32, %c0_i32_0, %c0_i32_1 : i32, i32, i32
  }
  func.func @transform_2(%arg0: i32, %arg1: i32) -> (i32, i32) {
    %c0_i32 = arith.constant 0 : i32
    return %arg0, %arg1 : i32, i32
  }
  func.func @transform_3(%arg0: i32, %arg1: i32) -> (i32, i32, i32) {
    %c0_i32 = arith.constant 0 : i32
    %c0_i32_0 = arith.constant 0 : i32
    return %arg0, %arg1, %c0_i32 : i32, i32, i32
  }
}

module attributes {stable_mosaic.version = 11 : i64} {
  func.func @_attn_kernel(%arg0: i32, %arg1: i32, %arg2: memref<2x8x32xf32, #tpu.memory_space<vmem>>, %arg3: memref<3x32x32xf32, #tpu.memory_space<vmem>>, %arg4: memref<2x8x32xf32, #tpu.memory_space<vmem>>, %arg5: memref<2x8x8xf32, #tpu.memory_space<vmem>>, %arg6: memref<2x8x32xf32, #tpu.memory_space<vmem>>, %arg7: memref<2x8x32xf32, #tpu.memory_space<vmem>>) attributes {dimension_semantics = [#tpu.dimension_semantics<parallel>, #tpu.dimension_semantics<arbitrary>], iteration_bounds = array<i64: 1, 1>, scalar_prefetch = 0 : i64, scratch_operands = 2 : i64, tpu.core_type = #tpu.core_type<tc>, window_params = [{transform_indices = @transform_0, window_bounds = array<i64: 2, 8, 32>}, {pipeline_mode = #tpu.pipeline_mode<synchronous>, transform_indices = @transform_1, window_bounds = array<i64: 3, 32, 32>}, {transform_indices = @transform_2, window_bounds = array<i64: 2, 8, 32>}, {transform_indices = @transform_3, window_bounds = array<i64: 2, 8, 8>}]} {
    %c0_i32 = arith.constant 0 : i32
    %0 = arith.cmpi eq, %arg1, %c0_i32 : i32
    %1 = arith.extui %0 : i1 to i32
    %c0_i32_0 = arith.constant 0 : i32
    %2 = arith.cmpi ne, %1, %c0_i32_0 : i32
    scf.if %2 {
      %c0_23 = arith.constant 0 : index
      %c0_24 = arith.constant 0 : index
      %c0_25 = arith.constant 0 : index
      %27 = vector.load %arg2[%c0_23, %c0_24, %c0_25] : memref<2x8x32xf32, #tpu.memory_space<vmem>>, vector<2x8x32xf32>
      %28 = vector.shape_cast %27 : vector<2x8x32xf32> to vector<16x32xf32>
      %c1 = arith.constant 1 : index
      %c0_26 = arith.constant 0 : index
      %c0_27 = arith.constant 0 : index
      %29 = vector.load %arg3[%c1, %c0_26, %c0_27] : memref<3x32x32xf32, #tpu.memory_space<vmem>>, vector<1x32x32xf32>
      %30 = vector.shape_cast %29 : vector<1x32x32xf32> to vector<32x32xf32>
      %cst_28 = arith.constant dense<0.000000e+00> : vector<16x32xf32>
      %31 = tpu.matmul %28, %30, %cst_28 {dimension_numbers = #tpu.dot_dimension_numbers<[1], [0], [0], [1], [0, 0, 1, 1], [], []>} : vector<16x32xf32>, vector<32x32xf32>, vector<16x32xf32> -> vector<16x32xf32>
      %c2 = arith.constant 2 : index
      %c0_29 = arith.constant 0 : index
      %c0_30 = arith.constant 0 : index
      %32 = vector.load %arg3[%c2, %c0_29, %c0_30] : memref<3x32x32xf32, #tpu.memory_space<vmem>>, vector<1x32x32xf32>
      %33 = vector.shape_cast %32 : vector<1x32x32xf32> to vector<32x32xf32>
      %cst_31 = arith.constant dense<0.000000e+00> : vector<16x32xf32>
      %34 = tpu.matmul %28, %33, %cst_31 {dimension_numbers = #tpu.dot_dimension_numbers<[1], [0], [0], [1], [0, 0, 1, 1], [], []>} : vector<16x32xf32>, vector<32x32xf32>, vector<16x32xf32> -> vector<16x32xf32>
      %35 = vector.shape_cast %31 : vector<16x32xf32> to vector<2x8x32xf32>
      %c0_32 = arith.constant 0 : index
      %c0_33 = arith.constant 0 : index
      %c0_34 = arith.constant 0 : index
      %36 = vector.load %arg6[%c0_32, %c0_33, %c0_34] : memref<2x8x32xf32, #tpu.memory_space<vmem>>, vector<2x8x32xf32>
      tpu.vector_store %arg6[%c0_32, %c0_33, %c0_34], %35 {strides = array<i32>} : memref<2x8x32xf32, #tpu.memory_space<vmem>>, vector<2x8x32xf32>,
      %37 = vector.shape_cast %34 : vector<16x32xf32> to vector<2x8x32xf32>
      %c0_35 = arith.constant 0 : index
      %c0_36 = arith.constant 0 : index
      %c0_37 = arith.constant 0 : index
      %38 = vector.load %arg7[%c0_35, %c0_36, %c0_37] : memref<2x8x32xf32, #tpu.memory_space<vmem>>, vector<2x8x32xf32>
      tpu.vector_store %arg7[%c0_35, %c0_36, %c0_37], %37 {strides = array<i32>} : memref<2x8x32xf32, #tpu.memory_space<vmem>>, vector<2x8x32xf32>,
    } else {
    }
    %c0 = arith.constant 0 : index
    %c0_1 = arith.constant 0 : index
    %c0_2 = arith.constant 0 : index
    %3 = vector.load %arg2[%c0, %c0_1, %c0_2] : memref<2x8x32xf32, #tpu.memory_space<vmem>>, vector<2x8x32xf32>
    %4 = vector.shape_cast %3 : vector<2x8x32xf32> to vector<16x32xf32>
    %c0_3 = arith.constant 0 : index
    %c0_4 = arith.constant 0 : index
    %c0_5 = arith.constant 0 : index
    %5 = vector.load %arg3[%c0_3, %c0_4, %c0_5] : memref<3x32x32xf32, #tpu.memory_space<vmem>>, vector<1x32x32xf32>
    %6 = vector.shape_cast %5 : vector<1x32x32xf32> to vector<32x32xf32>
    %cst = arith.constant dense<0.000000e+00> : vector<16x32xf32>
    %7 = tpu.matmul %4, %6, %cst {dimension_numbers = #tpu.dot_dimension_numbers<[1], [0], [0], [1], [0, 0, 1, 1], [], []>} : vector<16x32xf32>, vector<32x32xf32>, vector<16x32xf32> -> vector<16x32xf32>
    %8 = vector.shape_cast %7 : vector<16x32xf32> to vector<2x8x32xf32>
    %c0_6 = arith.constant 0 : index
    %c0_7 = arith.constant 0 : index
    %c0_8 = arith.constant 0 : index
    %9 = vector.load %arg6[%c0_6, %c0_7, %c0_8] : memref<2x8x32xf32, #tpu.memory_space<vmem>>, vector<2x8x32xf32>
    "tpu.trace_start"() <{level = 10 : i32, message = "bqd,bkd->bqk"}> : () -> ()
    %cst_9 = arith.constant dense<0.000000e+00> : vector<2x8x8xf32>
    %10 = tpu.matmul %8, %9, %cst_9 {dimension_numbers = #tpu.dot_dimension_numbers<[2], [2], [1], [1], [0, 0, 0, 1, 1, 1], [0], [0]>} : vector<2x8x32xf32>, vector<2x8x32xf32>, vector<2x8x8xf32> -> vector<2x8x8xf32>
    "tpu.trace_stop"() : () -> ()
    %cst_10 = arith.constant 0.176776692 : f32
    %11 = vector.broadcast %cst_10 : f32 to vector<2x8x8xf32>
    %12 = arith.mulf %10, %11 : vector<2x8x8xf32>
    %cst_11 = arith.constant dense<0xFF800000> : vector<2x8xf32>
    %13 = vector.multi_reduction <maximumf>, %12, %cst_11 [2] : vector<2x8x8xf32> to vector<2x8xf32>
    %14 = vector.shape_cast %13 : vector<2x8xf32> to vector<2x8x1xf32>
    %15 = vector.broadcast %14 : vector<2x8x1xf32> to vector<2x8x8xf32>
    %16 = arith.subf %12, %15 : vector<2x8x8xf32>
    %17 = math.exp %16 : vector<2x8x8xf32>
    %cst_12 = arith.constant dense<0.000000e+00> : vector<2x8xf32>
    %18 = vector.multi_reduction <add>, %17, %cst_12 [2] : vector<2x8x8xf32> to vector<2x8xf32>
    %19 = vector.shape_cast %18 : vector<2x8xf32> to vector<2x8x1xf32>
    %20 = tpu.reciprocal %19 : vector<2x8x1xf32> -> vector<2x8x1xf32>
    %21 = vector.broadcast %20 : vector<2x8x1xf32> to vector<2x8x8xf32>
    %22 = arith.mulf %17, %21 : vector<2x8x8xf32>
    %c0_13 = arith.constant 0 : index
    %c0_14 = arith.constant 0 : index
    %c0_15 = arith.constant 0 : index
    %23 = vector.load %arg7[%c0_13, %c0_14, %c0_15] : memref<2x8x32xf32, #tpu.memory_space<vmem>>, vector<2x8x32xf32>
    "tpu.trace_start"() <{level = 10 : i32, message = "bqk,bkd->bqd"}> : () -> ()
    %cst_16 = arith.constant dense<0.000000e+00> : vector<2x8x32xf32>
    %24 = tpu.matmul %22, %23, %cst_16 {dimension_numbers = #tpu.dot_dimension_numbers<[2], [1], [1], [2], [0, 0, 0, 1, 1, 2], [0], [0]>} : vector<2x8x8xf32>, vector<2x8x32xf32>, vector<2x8x32xf32> -> vector<2x8x32xf32>
    "tpu.trace_stop"() : () -> ()
    %c0_17 = arith.constant 0 : index
    %c0_18 = arith.constant 0 : index
    %c0_19 = arith.constant 0 : index
    %25 = vector.load %arg4[%c0_17, %c0_18, %c0_19] : memref<2x8x32xf32, #tpu.memory_space<vmem>>, vector<2x8x32xf32>
    tpu.vector_store %arg4[%c0_17, %c0_18, %c0_19], %24 {strides = array<i32>} : memref<2x8x32xf32, #tpu.memory_space<vmem>>, vector<2x8x32xf32>,
    %c0_20 = arith.constant 0 : index
    %c0_21 = arith.constant 0 : index
    %c0_22 = arith.constant 0 : index
    %26 = vector.load %arg5[%c0_20, %c0_21, %c0_22] : memref<2x8x8xf32, #tpu.memory_space<vmem>>, vector<2x8x8xf32>
    tpu.vector_store %arg5[%c0_20, %c0_21, %c0_22], %22 {strides = array<i32>} : memref<2x8x8xf32, #tpu.memory_space<vmem>>, vector<2x8x8xf32>,
    return
  }
  func.func @transform_0(%arg0: i32, %arg1: i32) -> (i32, i32, i32) {
    %c0_i32 = arith.constant 0 : i32
    %c0_i32_0 = arith.constant 0 : i32
    %c0_i32_1 = arith.constant 0 : i32
    return %arg0, %c0_i32, %c0_i32_0 : i32, i32, i32
  }
  func.func @transform_1(%arg0: i32, %arg1: i32) -> (i32, i32, i32) {
    %c0_i32 = arith.constant 0 : i32
    %c0_i32_0 = arith.constant 0 : i32
    %c0_i32_1 = arith.constant 0 : i32
    %c0_i32_2 = arith.constant 0 : i32
    return %c0_i32, %c0_i32_0, %c0_i32_1 : i32, i32, i32
  }
  func.func @transform_2(%arg0: i32, %arg1: i32) -> (i32, i32, i32) {
    %c0_i32 = arith.constant 0 : i32
    %c0_i32_0 = arith.constant 0 : i32
    return %arg0, %arg1, %c0_i32 : i32, i32, i32
  }
  func.func @transform_3(%arg0: i32, %arg1: i32) -> (i32, i32, i32) {
    %c0_i32 = arith.constant 0 : i32
    %c0_i32_0 = arith.constant 0 : i32
    return %arg0, %arg1, %c0_i32 : i32, i32, i32
  }
}

</mosaic_0001>

<bundles_post_ra>
// kernel: tpu_custom_call.1
= control target key start
LH: loop header
LB: loop body
LE: loop exit
PB: predicated region body
PF: predicated region fallthrough
CT: control target
= control target key end

     0   :  { %9 = vsyncpa [#allocation5], 0  ;;  %s1144_s0 = inlined_call_operand.hbm [shape: f32[2,8,32], index: 0, kind: input, shape index: {}]   ;;  %s1145_s1 = inlined_call_operand.hbm [shape: f32[3,32,32], index: 1, kind: input, shape index: {}]   ;;  %s1146_s2 = inlined_call_operand.hbm [shape: f32[2,256], index: 2, kind: output, shape index: {0}]   ;;  %s1147_s3 = inlined_call_operand.hbm [shape: f32[2,8,8], index: 3, kind: output, shape index: {1}]  }
   0x1   :  { %10 = vsyncpa [#allocation8], 0 }
   0x2   :  { %11 = vsyncpa [#allocation6], 0 }
   0x3   :  { %12 = vsyncpa [#allocation11], 0  ;;  %s1012_s12 = smov [#allocation4]   ;;  %s916_s16 = scalar_lea.hbm %s1144_s0, 256 }
   0x4   :  { %s18_s13 = sshll.u32 %s1012_s12, 4  ;;  %p917_p0 = scmp.ne.s32.totalorder %s1144_s0, %s916_s16  ;;  %s19_s13 = int_to_ptr.vmem [resolvable:$true] %s18_s13 }
   0x5   :  { %p920_p1 = scmp.lt.u32.totalorder %s916_s16, %s1144_s0 }
   0x7   :  { %p922_p2 = pnand %p920_p1, %p917_p0 }
   0x9   :  { %925 = shalt.err (!%p922_p2)
}
   0xa   :  { %s926_s21 = scalar_lea.vmem %s19_s13, 256  ;;  %p931_p4 = scmp.lt.s32.totalorder %s19_s13, %s19_s13 }
   0xb   :  { %p927_p3 = scmp.ne.s32.totalorder %s19_s13, %s926_s21  ;;  %p932_p5 = scmp.lt.s32.totalorder %s926_s21, %s926_s21 }
   0xd   :  { %p933_p6 = por %p932_p5, %p931_p4 }
   0xf   :  { %p934_p7 = pnand %p933_p6, %p927_p3 }
  0x11   :  { %937 = shalt.err (!%p934_p7)
}
  0x12   :  { %s1013_s22 = smov 128   ;;  %s1014_s23 = smov 8  }
  0x13   :  { %24 = dma.hbm_to_vmem [thread:$0]  %s1144_s0, 256, %s19_s13, [#allocation5], %s1013_s22, %s1013_s22, %s1014_s23  }
  0x14   :  { %s1015_s26 = smov [#allocation7]   ;;  %s938_s30 = scalar_lea.hbm %s1145_s1, 1536 }
  0x15   :  { %s30_s27 = sshll.u32 %s1015_s26, 4  ;;  %p939_p8 = scmp.ne.s32.totalorder %s1145_s1, %s938_s30  ;;  %s31_s27 = int_to_ptr.vmem [resolvable:$true] %s30_s27 }
  0x16   :  { %p942_p9 = scmp.lt.u32.totalorder %s938_s30, %s1145_s1 }
  0x18   :  { %p944_p10 = pnand %p942_p9, %p939_p8 }
  0x1a   :  { %947 = shalt.err (!%p944_p10)
}
  0x1b   :  { %s948_s8 = scalar_lea.vmem %s31_s27, 1536  ;;  %p953_p12 = scmp.lt.s32.totalorder %s31_s27, %s31_s27 }
  0x1c   :  { %p949_p11 = scmp.ne.s32.totalorder %s31_s27, %s948_s8  ;;  %p954_p13 = scmp.lt.s32.totalorder %s948_s8, %s948_s8 }
  0x1e   :  { %p955_p0 = por %p954_p13, %p953_p12 }
  0x20   :  { %p956_p1 = pnand %p955_p0, %p949_p11 }
  0x22   :  { %959 = shalt.err (!%p956_p1)
}
  0x23   :  { %36 = dma.hbm_to_vmem [thread:$0]  %s1145_s1, 1536, %s31_s27, [#allocation8], %s1013_s22, %s1013_s22, %s1014_s23  }
  0x24   :  { %1004 = dma.done.wait [#allocation5], 256  }
  0x25   :  { %1005 = vsyncadd [#allocation5], 4294967040 }
  0x26   :  { %1006 = dma.done.wait [#allocation8], 1536  }
  0x27   :  { %1007 = vsyncadd [#allocation8], 4294965760  ;;  %vm54_vm0 = vcmask 261120   ;;  %v50_v0 = vld [vmem:[#allocation7 + $0x20] sm:$0xff]  ;;  %v51_v1 = vld [vmem:[#allocation7 + $0x28] sm:$0xff]  ;;  %v1016_v20 = vmov 0.0   ;;  %v639_v57 = vlaneseq }
  0x28   :  { %v52_v2 = vld [vmem:[#allocation7 + $0x30] sm:$0xff]  ;;  %v871_v3 = vpack.c.bf16 %v51_v1, %v50_v0  ;;  %v53_v4 = vld [vmem:[#allocation7 + $0x38] sm:$0xff]  ;;  %v222_v7 = vld [vmem:[#allocation7] sm:$0xff]  ;;  %vm1017_vm1 = vmmov 0   ;;  %vm464_vm2 = vcmask 64512   ;;  %s1020_s1 = smov 64  }
  0x29   :  { %v47_v5 = vld [vmem:[#allocation4] sm:$0xff]  ;;  %v875_v6 = vpack.c.bf16 %v53_v4, %v52_v2  ;;  %v223_v8 = vld [vmem:[#allocation7 + $0x8] sm:$0xff]  ;;  %v137_v9 = vld [vmem:[#allocation7 + $0x40] sm:$0xff]  ;;  %v1018_v55 = vmov 1983009808   ;;  %v640_v59 = vshrl.u32 %v639_v57, 7 }
  0x2a   :  { %826 = vmatprep.mubr.msk.f32.mxu0 %vm54_vm0, %v47_v5  ;;  %837 = vmatprep.mubr.msk.f32.mxu1 %vm54_vm0, %v47_v5  ;;  %v138_v10 = vld [vmem:[#allocation7 + $0x48] sm:$0xff]  ;;  %v887_v12 = vpack.c.bf16 %v223_v8, %v222_v7  ;;  %v224_v13 = vld [vmem:[#allocation7 + $0x10] sm:$0xff]  ;;  %v225_v14 = vld [vmem:[#allocation7 + $0x18] sm:$0xff]  ;;  %v637_v56 = vunpack.c.l.s4 %v1018_v55  ;;  %v1019_v60 = vmov 1934713408   ;;  %s1021_s10 = smov [#allocation10]  }
  0x2b   :  { %872 = vmatprep.subr.bf16.mxu0 %v871_v3  ;;  %v879_v11 = vpack.c.bf16 %v138_v10, %v137_v9  ;;  %v48_v15 = vld [vmem:[#allocation4 + $0x8] sm:$0xff]  ;;  %v891_v16 = vpack.c.bf16 %v225_v14, %v224_v13  ;;  %v139_v17 = vld [vmem:[#allocation7 + $0x50] sm:$0xff]  ;;  %v668_v61 = vunpack.c.l.s4 %v1019_v60  ;;  %s762_s11 = sshll.u32 %s1021_s10, 4  ;;  %s1022_s12 = smov 32   ;;  %s763_s11 = int_to_ptr.vmem [resolvable:$true] %s762_s11 }
  0x2c   :  { %874 = vmatpush3.bf16.msra.mxu0 %v871_v3  ;;  %v140_v18 = vld [vmem:[#allocation7 + $0x58] sm:$0xff]  ;;  %v638_v58 = vunpack.c.0.s8 %v637_v56  ;;  %s960_s13 = scalar_lea.vmem %s763_s11, 256  ;;  %p965_p3 = scmp.lt.s32.totalorder %s763_s11, %s763_s11 }
  0x2d   :  { %876 = vmatprep.subr.bf16.mxu0 %v875_v6  ;;  %880 = vmatprep.subr.bf16.mxu1 %v879_v11  ;;  %v883_v19 = vpack.c.bf16 %v140_v18, %v139_v17  ;;  %v669_v1 = vunpack.c.0.s8 %v668_v61  ;;  %p961_p2 = scmp.ne.s32.totalorder %s763_s11, %s960_s13  ;;  %p966_p4 = scmp.lt.s32.totalorder %s960_s13, %s960_s13 }
  0x2e   :  { %882 = vmatpush3.bf16.msra.mxu1 %v879_v11  ;;  %v641_v63 = vsub.s32 %v638_v58, %v640_v59 }
  0x2f   :  { %884 = vmatprep.subr.bf16.mxu1 %v883_v19  ;;  %v672_v7 = vsub.s32 %v669_v1, %v640_v59  ;;  %p967_p5 = por %p966_p4, %p965_p3 }
  0x30   :  { %878 = vmatpush3.bf16.msra.mxu0 %v875_v6 }
  0x31   :  { %888 = vmatprep.subr.bf16.mxu0 %v887_v12  ;;  %p968_p6 = pnand %p967_p5, %p961_p2 }
  0x32   :  { %886 = vmatpush3.bf16.msra.mxu1 %v883_v19 }
  0x33   :  { %827 = vmatmul.mubr.msk.f32.vlgmr.msra.gmra.mrb[0].mxu0 %vm54_vm0, %v48_v15  ;;  %851 = vmatprep.subr.mxu1 %v1016_v20 }
  0x34   :  { %890 = vmatpush3.bf16.msra.mxu0 %v887_v12  ;;  %848 = vmatprep.mubr.msk.f32.mxu0 %vm54_vm0, %v47_v5 }
  0x35   :  { %892 = vmatprep.subr.bf16.mxu0 %v891_v16  ;;  %838 = vmatmul.mubr.msk.f32.vlgmr.msra.gmra.mrb[0].mxu1 %vm54_vm0, %v48_v15 }
  0x36   :  { %853 = vmatprep.mubr.msk.f32.mxu1 %vm1017_vm1, %v1016_v20 }
  0x38   :  { %894 = vmatpush3.bf16.msra.mxu0 %v891_v16 }
  0x39   :  { %861 = vmatprep.subr.mxu0 %v1016_v20 }
  0x3b   :  { %849 = vmatmul.mubr.msk.f32.vlgmr.msra.gmra.mrb[2].mxu0 %vm54_vm0, %v48_v15 }
  0x3c   :  { %863 = vmatprep.mubr.msk.f32.mxu0 %vm1017_vm1, %v1016_v20 }
 0x106   :  { %v828_v21 = vpop.f32.mrb[0].mxu0 }
 0x107   :  { %217 = vst.msk [vmem:[#allocation2 + $0x8] sm:$0xff] %vm54_vm0, %v828_v21  ;;  %v127_v22 = vpop.f32.mrb[1].mxu0 }
 0x108   :  { %216 = vst.msk [vmem:[#allocation2] sm:$0xff] %vm54_vm0, %v127_v22  ;;  %v839_v27 = vpop.f32.mrb[0].mxu1 }
 0x109   :  { %219 = vst.msk [vmem:[#allocation3 + $0x8] sm:$0xff] %vm54_vm0, %v839_v27  ;;  %v207_v28 = vpop.f32.mrb[1].mxu1 }
 0x10a   :  { %218 = vst.msk [vmem:[#allocation3] sm:$0xff] %vm54_vm0, %v207_v28 }
 0x10e   :  { %v850_v23 = vpop.f32.mrb[2].mxu0  ;;  %v309_v26 = vld [vmem:[#allocation2 + $0x8] sm:$0xff] }
 0x10f   :  { %v308_v24 = vld [vmem:[#allocation2] sm:$0xff]  ;;  %v299_v25 = vpop.f32.mrb[3].mxu0 }
 0x110   :  { %852 = vmatpush3.xpose.msk.msra.mxu1 %vm54_vm0, %v308_v24  ;;  %v488_v30 = vld [vmem:[#allocation3 + $0x8] sm:$0xff] }
 0x111   :  { %856 = vmatprep.subr.mxu1 %v1016_v20  ;;  %v487_v29 = vld [vmem:[#allocation3] sm:$0xff] }
 0x112   :  { %862 = vmatpush3.msra.mxu0 %v487_v29 }
 0x113   :  { %854 = vmatmul.mubr.msk.f32.vlgmr.msra.gmra.mrb[2].mxu1 %vm54_vm0, %v299_v25 }
 0x114   :  { %857 = vmatpush3.xpose.msk.msra.mxu1 %vm54_vm0, %v309_v26  ;;  %858 = vmatprep.mubr.msk.f32.mxu1 %vm1017_vm1, %v1016_v20 }
 0x115   :  { %866 = vmatprep.subr.mxu1 %v1016_v20 }
 0x117   :  { %859 = vmatmul.mubr.msk.f32.vlgmr.msra.gmra.mrb[4].mxu1 %vm54_vm0, %v850_v23 }
 0x118   :  { %868 = vmatprep.mubr.msk.f32.mxu1 %vm1017_vm1, %v1016_v20  ;;  %867 = vmatpush3.msra.mxu1 %v488_v30 }
 0x1e6   :  { %v382_v31 = vpop.f32.mrb[2].mxu1 }
 0x1e7   :  { %v462_v32 = vmul.f32 0.17677669, %v382_v31  ;;  %v855_v33 = vpop.f32.mrb[3].mxu1 }
 0x1e9   :  { %v465_v34 = vsel %vm464_vm2, %v462_v32, -inf }
 0x1ea   :  { %466 = vmax.xlane.f32.xlu0 %v465_v34  ;;  %v458_v35 = vpop.f32.mrb[4].mxu1 }
 0x1eb   :  { %v463_v36 = vmul.f32 0.17677669, %v458_v35  ;;  %v860_v37 = vpop.f32.mrb[5].mxu1 }
 0x1ed   :  { %v468_v38 = vsel %vm464_vm2, %v463_v36, -inf }
 0x1ee   :  { %469 = vmax.xlane.f32.xlu0 %v468_v38 }
 0x277   :  { %v467_v39 = vpop.xlane.xlu0 %466 }
 0x278   :  { %v471_v40 = vsub.f32 %v462_v32, %v467_v39 }
 0x27a   :  { %v473_v41 = vmul.f32 1.442695, %v471_v40 }
 0x27b   :  { %v470_v42 = vpop.xlane.xlu0 %469 }
 0x27c   :  { %908 = vpow2.f32 %v473_v41  ;;  %v472_v43 = vsub.f32 %v463_v36, %v470_v42 }
 0x27e   :  { %v475_v44 = vmul.f32 1.442695, %v472_v43 }
 0x280   :  { %910 = vpow2.f32 %v475_v44 }
 0x286   :  { %v909_v45 = vpop.eup %908 }
 0x287   :  { %v477_v46 = vsel %vm464_vm2, %v909_v45, 0.0 }
 0x288   :  { %478 = vadd.xlane.f32.xlu1 %v477_v46 }
 0x28a   :  { %v911_v47 = vpop.eup %910 }
 0x28b   :  { %v480_v48 = vsel %vm464_vm2, %v911_v47, 0.0 }
 0x28c   :  { %481 = vadd.xlane.f32.xlu1 %v480_v48 }
 0x315   :  { %v479_v49 = vpop.xlane.xlu1 %478 }
 0x316   :  { %912 = vrcp.f32 %v479_v49 }
 0x319   :  { %v482_v50 = vpop.xlane.xlu1 %481 }
 0x31a   :  { %914 = vrcp.f32 %v482_v50 }
 0x320   :  { %v913_v51 = vpop.eup %912 }
 0x321   :  { %v485_v52 = vmul.f32 %v913_v51, %v909_v45 }
 0x323   :  { %745 = vst.msk [vmem:[#allocation10] sm:$0xff] %vm464_vm2, %v485_v52  ;;  %864 = vmatmul.mubr.msk.f32.vlgmr.msra.gmra.mrb[4].mxu0 %vm464_vm2, %v485_v52 }
 0x324   :  { %v915_v53 = vpop.eup %914 }
 0x325   :  { %v486_v54 = vmul.f32 %v915_v53, %v911_v47 }
 0x327   :  { %746 = vst.msk [vmem:[#allocation10 + $0x8] sm:$0xff] %vm464_vm2, %v486_v54  ;;  %869 = vmatmul.mubr.msk.f32.vlgmr.msra.gmra.mrb[6].mxu1 %vm464_vm2, %v486_v54 }
 0x3f6   :  { %v558_v62 = vpop.f32.mrb[4].mxu0 }
 0x3f7   :  { %v865_v0 = vpop.f32.mrb[5].mxu0  ;;  %v635_v2 = vcombine.high %v558_v62, %v1016_v20  ;;  %v642_v4 = vrot.slane %v558_v62, %v641_v63 }
 0x3f9   :  { %v649_v9 = vrot.slane %v635_v2, %v641_v63 }
 0x3fa   :  { %v631_v3 = vpop.f32.mrb[6].mxu1 }
 0x3fb   :  { %v650_v5 = vcombine.high %v631_v3, %v1016_v20  ;;  %v657_v6 = vrot.slane %v631_v3, %v641_v63  ;;  %v870_v8 = vpop.f32.mrb[7].mxu1 }
 0x3fd   :  { %v664_v10 = vrot.slane %v650_v5, %v641_v63  ;;  %v665_v11 = vcombine.low %v642_v4, %v657_v6  ;;  %v666_v12 = vcombine.high %v642_v4, %v657_v6 }
 0x3ff   :  { %v673_v13 = vrot.slane %v665_v11, %v672_v7  ;;  %v681_v14 = vcombine.low %v649_v9, %v664_v10  ;;  %v682_v15 = vcombine.high %v649_v9, %v664_v10  ;;  %v680_v16 = vrot.slane %v666_v12, %v672_v7 }
 0x401   :  { %706 = vrot.lane.b32.xlu1 %v680_v16, %s1020_s1  ;;  %v697_v17 = vcombine.high %v673_v13, %v1016_v20  ;;  %v696_v18 = vrot.slane %v682_v15, %v672_v7  ;;  %v689_v19 = vrot.slane %v681_v14, %v672_v7 }
 0x403   :  { %702 = vrot.lane.b32.xlu0 %v697_v17, %s1022_s12 }
 0x404   :  { %971 = shalt.err (!%p968_p6)
}
 0x405   :  { %s972_s16 = scalar_lea.hbm %s1147_s3, 256 }
 0x406   :  { %p973_p7 = scmp.ne.s32.totalorder %s1147_s3, %s972_s16  ;;  %p976_p8 = scmp.lt.u32.totalorder %s972_s16, %s1147_s3 }
 0x408   :  { %p978_p9 = pnand %p976_p8, %p973_p7 }
 0x40a   :  { %981 = shalt.err (!%p978_p9)
}
 0x40b   :  { %768 = dma.vmem_to_hbm [thread:$0]  %s763_s11, 256, %s1147_s3, [#allocation11], %s1013_s22, %s1013_s22, %s1014_s23   ;;  %v698_v21 = vcombine.high %v680_v16, %v1016_v20  ;;  %v699_v22 = vcombine.high %v689_v19, %v1016_v20  ;;  %v700_v23 = vcombine.high %v696_v18, %v1016_v20  ;;  %vm726_vm3 = vcmask 523264  }
 0x40c   :  { %718 = vrot.lane.b32.xlu1 %v696_v18, %s1020_s1  ;;  %s1023_s25 = smov 96   ;;  %vm728_vm4 = vcmask 785408   ;;  %s1024_s3 = smov [#allocation9]  }
 0x40d   :  { %710 = vrot.lane.b32.xlu0 %v698_v21, %s1023_s25  ;;  %s753_s22 = sshll.u32 %s1024_s3, 4  ;;  %s754_s22 = int_to_ptr.vmem [resolvable:$true] %s753_s22 }
 0x40e   :  { %s982_s23 = scalar_lea.vmem %s754_s22, 64  ;;  %p987_p11 = scmp.lt.s32.totalorder %s754_s22, %s754_s22 }
 0x40f   :  { %p983_p10 = scmp.ne.s32.totalorder %s754_s22, %s982_s23  ;;  %p988_p12 = scmp.lt.s32.totalorder %s982_s23, %s982_s23 }
 0x410   :  { %714 = vrot.lane.b32.xlu1 %v699_v22, %s1022_s12 }
 0x411   :  { %p989_p13 = por %p988_p12, %p987_p11 }
 0x413   :  { %p990_p0 = pnand %p989_p13, %p983_p10 }
 0x414   :  { %722 = vrot.lane.b32.xlu1 %v700_v23, %s1023_s25 }
 0x473   :  { %v707_v24 = vpop.permute.xlu1 %706 }
 0x475   :  { %v703_v25 = vpop.permute.xlu0 %702 }
 0x476   :  { %v725_v28 = vsel %vm54_vm0, %v673_v13, %v703_v25 }
 0x477   :  { %v727_v31 = vsel %vm726_vm3, %v725_v28, %v707_v24 }
 0x47e   :  { %v719_v26 = vpop.permute.xlu1 %718 }
 0x47f   :  { %v711_v30 = vpop.permute.xlu0 %710 }
 0x480   :  { %v729_v34 = vsel %vm728_vm4, %v727_v31, %v711_v30 }
 0x482   :  { %v715_v27 = vpop.permute.xlu1 %714 }
 0x483   :  { %v730_v29 = vsel %vm54_vm0, %v689_v19, %v715_v27 }
 0x484   :  { %v731_v32 = vsel %vm726_vm3, %v730_v29, %v719_v26 }
 0x486   :  { %v723_v33 = vpop.permute.xlu1 %722 }
 0x487   :  { %v732_v35 = vsel %vm728_vm4, %v731_v32, %v723_v33 }
 0x488   :  { %v735_v20 = vcombine.low %v729_v34, %v732_v35 }
 0x48a   :  { %791 = vst.sshfl [vmem:[#allocation9] sm:$0x33 pattern:$0x76325410] %v735_v20 }
 0x48b   :  { %993 = shalt.err (!%p990_p0)
}
 0x48c   :  { %s994_s28 = scalar_lea.hbm %s1146_s2, 64 }
 0x48d   :  { %p995_p1 = scmp.ne.s32.totalorder %s1146_s2, %s994_s28  ;;  %p998_p2 = scmp.lt.u32.totalorder %s994_s28, %s1146_s2 }
 0x48f   :  { %p1000_p3 = pnand %p998_p2, %p995_p1 }
 0x491   :  { %1003 = shalt.err (!%p1000_p3)
}
 0x492   :  { %756 = dma.vmem_to_hbm [thread:$0]  %s754_s22, 64, %s1146_s2, [#allocation6]  }
 0x493   :  { %1008 = dma.done.wait [#allocation6], 64  }
 0x494   :  { %1009 = vsyncadd [#allocation6], 4294967232 }
 0x495   :  { %1010 = dma.done.wait [#allocation11], 256  }
 0x496   :  { %1011 = vsyncadd [#allocation11], 4294967040 }
 0x497   :  { %775 = vsyncpa [#allocation5], 1 }
 0x498   :  { %776 = vsyncpa [#allocation8], 1 }
 0x499   :  { %777 = vsyncpa [#allocation6], 1 }
 0x49a   :  { %778 = vsyncpa [#allocation11], 1 }

// kernel: tpu_custom_call.1
= control target key start
LH: loop header
LB: loop body
LE: loop exit
PB: predicated region body
PF: predicated region fallthrough
CT: control target
= control target key end

     0   :  { %9 = vsyncpa [#allocation5], 0  ;;  %s1016_s0 = inlined_call_operand.hbm [shape: f32[2,8,32], index: 0, kind: input, shape index: {}]   ;;  %s1017_s1 = inlined_call_operand.hbm [shape: f32[3,32,32], index: 1, kind: input, shape index: {}]   ;;  %s1018_s2 = inlined_call_operand.hbm [shape: f32[2,8,32], index: 2, kind: output, shape index: {0}]   ;;  %s1019_s3 = inlined_call_operand.hbm [shape: f32[2,8,8], index: 3, kind: output, shape index: {1}]  }
   0x1   :  { %10 = vsyncpa [#allocation8], 0 }
   0x2   :  { %11 = vsyncpa [#allocation6], 0 }
   0x3   :  { %12 = vsyncpa [#allocation11], 0  ;;  %s900_s12 = smov [#allocation4]   ;;  %s804_s16 = scalar_lea.hbm %s1016_s0, 256 }
   0x4   :  { %s18_s13 = sshll.u32 %s900_s12, 4  ;;  %p805_p0 = scmp.ne.s32.totalorder %s1016_s0, %s804_s16  ;;  %s19_s13 = int_to_ptr.vmem [resolvable:$true] %s18_s13 }
   0x5   :  { %p808_p1 = scmp.lt.u32.totalorder %s804_s16, %s1016_s0 }
   0x7   :  { %p810_p2 = pnand %p808_p1, %p805_p0 }
   0x9   :  { %813 = shalt.err (!%p810_p2)
}
   0xa   :  { %s814_s21 = scalar_lea.vmem %s19_s13, 256  ;;  %p819_p4 = scmp.lt.s32.totalorder %s19_s13, %s19_s13 }
   0xb   :  { %p815_p3 = scmp.ne.s32.totalorder %s19_s13, %s814_s21  ;;  %p820_p5 = scmp.lt.s32.totalorder %s814_s21, %s814_s21 }
   0xd   :  { %p821_p6 = por %p820_p5, %p819_p4 }
   0xf   :  { %p822_p7 = pnand %p821_p6, %p815_p3 }
  0x11   :  { %825 = shalt.err (!%p822_p7)
}
  0x12   :  { %s901_s22 = smov 128   ;;  %s902_s23 = smov 8  }
  0x13   :  { %24 = dma.hbm_to_vmem [thread:$0]  %s1016_s0, 256, %s19_s13, [#allocation5], %s901_s22, %s901_s22, %s902_s23  }
  0x14   :  { %s903_s26 = smov [#allocation7]   ;;  %s826_s30 = scalar_lea.hbm %s1017_s1, 1536 }
  0x15   :  { %s30_s27 = sshll.u32 %s903_s26, 4  ;;  %p827_p8 = scmp.ne.s32.totalorder %s1017_s1, %s826_s30  ;;  %s31_s27 = int_to_ptr.vmem [resolvable:$true] %s30_s27 }
  0x16   :  { %p830_p9 = scmp.lt.u32.totalorder %s826_s30, %s1017_s1 }
  0x18   :  { %p832_p10 = pnand %p830_p9, %p827_p8 }
  0x1a   :  { %835 = shalt.err (!%p832_p10)
}
  0x1b   :  { %s836_s8 = scalar_lea.vmem %s31_s27, 1536  ;;  %p841_p12 = scmp.lt.s32.totalorder %s31_s27, %s31_s27 }
  0x1c   :  { %p837_p11 = scmp.ne.s32.totalorder %s31_s27, %s836_s8  ;;  %p842_p13 = scmp.lt.s32.totalorder %s836_s8, %s836_s8 }
  0x1e   :  { %p843_p0 = por %p842_p13, %p841_p12 }
  0x20   :  { %p844_p1 = pnand %p843_p0, %p837_p11 }
  0x22   :  { %847 = shalt.err (!%p844_p1)
}
  0x23   :  { %36 = dma.hbm_to_vmem [thread:$0]  %s1017_s1, 1536, %s31_s27, [#allocation8], %s901_s22, %s901_s22, %s902_s23  }
  0x24   :  { %892 = dma.done.wait [#allocation5], 256  }
  0x25   :  { %893 = vsyncadd [#allocation5], 4294967040 }
  0x26   :  { %894 = dma.done.wait [#allocation8], 1536  }
  0x27   :  { %895 = vsyncadd [#allocation8], 4294965760  ;;  %vm54_vm0 = vcmask 261120   ;;  %v50_v0 = vld [vmem:[#allocation7 + $0x20] sm:$0xff]  ;;  %v51_v1 = vld [vmem:[#allocation7 + $0x28] sm:$0xff]  ;;  %v904_v20 = vmov 0.0  }
  0x28   :  { %v52_v2 = vld [vmem:[#allocation7 + $0x30] sm:$0xff]  ;;  %v764_v3 = vpack.c.bf16 %v51_v1, %v50_v0  ;;  %v53_v4 = vld [vmem:[#allocation7 + $0x38] sm:$0xff]  ;;  %v222_v7 = vld [vmem:[#allocation7] sm:$0xff]  ;;  %vm905_vm1 = vmmov 0   ;;  %vm464_vm2 = vcmask 64512   ;;  %s906_s1 = smov [#allocation10]  }
  0x29   :  { %v47_v5 = vld [vmem:[#allocation4] sm:$0xff]  ;;  %v768_v6 = vpack.c.bf16 %v53_v4, %v52_v2  ;;  %v223_v8 = vld [vmem:[#allocation7 + $0x8] sm:$0xff]  ;;  %v137_v9 = vld [vmem:[#allocation7 + $0x40] sm:$0xff]  ;;  %s656_s10 = sshll.u32 %s906_s1, 4  ;;  %s657_s10 = int_to_ptr.vmem [resolvable:$true] %s656_s10 }
  0x2a   :  { %719 = vmatprep.mubr.msk.f32.mxu0 %vm54_vm0, %v47_v5  ;;  %730 = vmatprep.mubr.msk.f32.mxu1 %vm54_vm0, %v47_v5  ;;  %v138_v10 = vld [vmem:[#allocation7 + $0x48] sm:$0xff]  ;;  %v780_v12 = vpack.c.bf16 %v223_v8, %v222_v7  ;;  %v224_v13 = vld [vmem:[#allocation7 + $0x10] sm:$0xff]  ;;  %v225_v14 = vld [vmem:[#allocation7 + $0x18] sm:$0xff]  ;;  %s848_s11 = scalar_lea.vmem %s657_s10, 256  ;;  %p853_p3 = scmp.lt.s32.totalorder %s657_s10, %s657_s10 }
  0x2b   :  { %765 = vmatprep.subr.bf16.mxu0 %v764_v3  ;;  %v772_v11 = vpack.c.bf16 %v138_v10, %v137_v9  ;;  %v48_v15 = vld [vmem:[#allocation4 + $0x8] sm:$0xff]  ;;  %v784_v16 = vpack.c.bf16 %v225_v14, %v224_v13  ;;  %v139_v17 = vld [vmem:[#allocation7 + $0x50] sm:$0xff]  ;;  %p849_p2 = scmp.ne.s32.totalorder %s657_s10, %s848_s11  ;;  %p854_p4 = scmp.lt.s32.totalorder %s848_s11, %s848_s11 }
  0x2c   :  { %767 = vmatpush3.bf16.msra.mxu0 %v764_v3  ;;  %v140_v18 = vld [vmem:[#allocation7 + $0x58] sm:$0xff] }
  0x2d   :  { %769 = vmatprep.subr.bf16.mxu0 %v768_v6  ;;  %773 = vmatprep.subr.bf16.mxu1 %v772_v11  ;;  %v776_v19 = vpack.c.bf16 %v140_v18, %v139_v17  ;;  %p855_p5 = por %p854_p4, %p853_p3 }
  0x2e   :  { %775 = vmatpush3.bf16.msra.mxu1 %v772_v11 }
  0x2f   :  { %777 = vmatprep.subr.bf16.mxu1 %v776_v19  ;;  %p856_p6 = pnand %p855_p5, %p849_p2 }
  0x30   :  { %771 = vmatpush3.bf16.msra.mxu0 %v768_v6 }
  0x31   :  { %781 = vmatprep.subr.bf16.mxu0 %v780_v12 }
  0x32   :  { %779 = vmatpush3.bf16.msra.mxu1 %v776_v19 }
  0x33   :  { %720 = vmatmul.mubr.msk.f32.vlgmr.msra.gmra.mrb[0].mxu0 %vm54_vm0, %v48_v15  ;;  %744 = vmatprep.subr.mxu1 %v904_v20 }
  0x34   :  { %783 = vmatpush3.bf16.msra.mxu0 %v780_v12  ;;  %741 = vmatprep.mubr.msk.f32.mxu0 %vm54_vm0, %v47_v5 }
  0x35   :  { %785 = vmatprep.subr.bf16.mxu0 %v784_v16  ;;  %731 = vmatmul.mubr.msk.f32.vlgmr.msra.gmra.mrb[0].mxu1 %vm54_vm0, %v48_v15 }
  0x36   :  { %746 = vmatprep.mubr.msk.f32.mxu1 %vm905_vm1, %v904_v20 }
  0x38   :  { %787 = vmatpush3.bf16.msra.mxu0 %v784_v16 }
  0x39   :  { %754 = vmatprep.subr.mxu0 %v904_v20 }
  0x3b   :  { %742 = vmatmul.mubr.msk.f32.vlgmr.msra.gmra.mrb[2].mxu0 %vm54_vm0, %v48_v15 }
  0x3c   :  { %756 = vmatprep.mubr.msk.f32.mxu0 %vm905_vm1, %v904_v20 }
 0x106   :  { %v721_v21 = vpop.f32.mrb[0].mxu0 }
 0x107   :  { %217 = vst.msk [vmem:[#allocation2 + $0x8] sm:$0xff] %vm54_vm0, %v721_v21  ;;  %v127_v22 = vpop.f32.mrb[1].mxu0 }
 0x108   :  { %216 = vst.msk [vmem:[#allocation2] sm:$0xff] %vm54_vm0, %v127_v22  ;;  %v732_v27 = vpop.f32.mrb[0].mxu1 }
 0x109   :  { %219 = vst.msk [vmem:[#allocation3 + $0x8] sm:$0xff] %vm54_vm0, %v732_v27  ;;  %v207_v28 = vpop.f32.mrb[1].mxu1 }
 0x10a   :  { %218 = vst.msk [vmem:[#allocation3] sm:$0xff] %vm54_vm0, %v207_v28 }
 0x10e   :  { %v743_v23 = vpop.f32.mrb[2].mxu0  ;;  %v309_v26 = vld [vmem:[#allocation2 + $0x8] sm:$0xff] }
 0x10f   :  { %v308_v24 = vld [vmem:[#allocation2] sm:$0xff]  ;;  %v299_v25 = vpop.f32.mrb[3].mxu0 }
 0x110   :  { %745 = vmatpush3.xpose.msk.msra.mxu1 %vm54_vm0, %v308_v24  ;;  %v488_v30 = vld [vmem:[#allocation3 + $0x8] sm:$0xff] }
 0x111   :  { %749 = vmatprep.subr.mxu1 %v904_v20  ;;  %v487_v29 = vld [vmem:[#allocation3] sm:$0xff] }
 0x112   :  { %755 = vmatpush3.msra.mxu0 %v487_v29 }
 0x113   :  { %747 = vmatmul.mubr.msk.f32.vlgmr.msra.gmra.mrb[2].mxu1 %vm54_vm0, %v299_v25 }
 0x114   :  { %750 = vmatpush3.xpose.msk.msra.mxu1 %vm54_vm0, %v309_v26  ;;  %751 = vmatprep.mubr.msk.f32.mxu1 %vm905_vm1, %v904_v20 }
 0x115   :  { %759 = vmatprep.subr.mxu1 %v904_v20 }
 0x117   :  { %752 = vmatmul.mubr.msk.f32.vlgmr.msra.gmra.mrb[4].mxu1 %vm54_vm0, %v743_v23 }
 0x118   :  { %761 = vmatprep.mubr.msk.f32.mxu1 %vm905_vm1, %v904_v20  ;;  %760 = vmatpush3.msra.mxu1 %v488_v30 }
 0x1e6   :  { %v382_v31 = vpop.f32.mrb[2].mxu1 }
 0x1e7   :  { %v462_v32 = vmul.f32 0.17677669, %v382_v31  ;;  %v748_v33 = vpop.f32.mrb[3].mxu1 }
 0x1e9   :  { %v465_v34 = vsel %vm464_vm2, %v462_v32, -inf }
 0x1ea   :  { %466 = vmax.xlane.f32.xlu0 %v465_v34  ;;  %v458_v35 = vpop.f32.mrb[4].mxu1 }
 0x1eb   :  { %v463_v36 = vmul.f32 0.17677669, %v458_v35  ;;  %v753_v37 = vpop.f32.mrb[5].mxu1 }
 0x1ed   :  { %v468_v38 = vsel %vm464_vm2, %v463_v36, -inf }
 0x1ee   :  { %469 = vmax.xlane.f32.xlu0 %v468_v38 }
 0x277   :  { %v467_v39 = vpop.xlane.xlu0 %466 }
 0x278   :  { %v471_v40 = vsub.f32 %v462_v32, %v467_v39 }
 0x27a   :  { %v473_v41 = vmul.f32 1.442695, %v471_v40 }
 0x27b   :  { %v470_v42 = vpop.xlane.xlu0 %469 }
 0x27c   :  { %796 = vpow2.f32 %v473_v41  ;;  %v472_v43 = vsub.f32 %v463_v36, %v470_v42 }
 0x27e   :  { %v475_v44 = vmul.f32 1.442695, %v472_v43 }
 0x280   :  { %798 = vpow2.f32 %v475_v44 }
 0x286   :  { %v797_v45 = vpop.eup %796 }
 0x287   :  { %v477_v46 = vsel %vm464_vm2, %v797_v45, 0.0 }
 0x288   :  { %478 = vadd.xlane.f32.xlu1 %v477_v46 }
 0x28a   :  { %v799_v47 = vpop.eup %798 }
 0x28b   :  { %v480_v48 = vsel %vm464_vm2, %v799_v47, 0.0 }
 0x28c   :  { %481 = vadd.xlane.f32.xlu1 %v480_v48 }
 0x315   :  { %v479_v49 = vpop.xlane.xlu1 %478 }
 0x316   :  { %800 = vrcp.f32 %v479_v49 }
 0x319   :  { %v482_v50 = vpop.xlane.xlu1 %481 }
 0x31a   :  { %802 = vrcp.f32 %v482_v50 }
 0x320   :  { %v801_v51 = vpop.eup %800 }
 0x321   :  { %v485_v52 = vmul.f32 %v801_v51, %v797_v45 }
 0x323   :  { %637 = vst.msk [vmem:[#allocation10] sm:$0xff] %vm464_vm2, %v485_v52  ;;  %757 = vmatmul.mubr.msk.f32.vlgmr.msra.gmra.mrb[4].mxu0 %vm464_vm2, %v485_v52 }
 0x324   :  { %v803_v53 = vpop.eup %802 }
 0x325   :  { %v486_v54 = vmul.f32 %v803_v53, %v799_v47 }
 0x327   :  { %638 = vst.msk [vmem:[#allocation10 + $0x8] sm:$0xff] %vm464_vm2, %v486_v54  ;;  %762 = vmatmul.mubr.msk.f32.vlgmr.msra.gmra.mrb[6].mxu1 %vm464_vm2, %v486_v54 }
 0x328   :  { %859 = shalt.err (!%p856_p6)
}
 0x329   :  { %s860_s14 = scalar_lea.hbm %s1019_s3, 256 }
 0x32a   :  { %p861_p7 = scmp.ne.s32.totalorder %s1019_s3, %s860_s14  ;;  %p864_p8 = scmp.lt.u32.totalorder %s860_s14, %s1019_s3 }
 0x32c   :  { %p866_p9 = pnand %p864_p8, %p861_p7 }
 0x32e   :  { %869 = shalt.err (!%p866_p9)
}
 0x32f   :  { %662 = dma.vmem_to_hbm [thread:$0]  %s657_s10, 256, %s1019_s3, [#allocation11], %s901_s22, %s901_s22, %s902_s23  }
 0x330   :  { %s907_s21 = smov [#allocation9]  }
 0x331   :  { %s644_s24 = sshll.u32 %s907_s21, 4  ;;  %s645_s24 = int_to_ptr.vmem [resolvable:$true] %s644_s24 }
 0x332   :  { %s870_s25 = scalar_lea.vmem %s645_s24, 256  ;;  %p875_p11 = scmp.lt.s32.totalorder %s645_s24, %s645_s24 }
 0x333   :  { %p871_p10 = scmp.ne.s32.totalorder %s645_s24, %s870_s25  ;;  %p876_p12 = scmp.lt.s32.totalorder %s870_s25, %s870_s25 }
 0x335   :  { %p877_p13 = por %p876_p12, %p875_p11 }
 0x337   :  { %p878_p0 = pnand %p877_p13, %p871_p10 }
 0x3f6   :  { %v558_v55 = vpop.f32.mrb[4].mxu0 }
 0x3f7   :  { %635 = vst.msk [vmem:[#allocation9] sm:$0xff] %vm54_vm0, %v558_v55  ;;  %v758_v56 = vpop.f32.mrb[5].mxu0 }
 0x3fa   :  { %v631_v57 = vpop.f32.mrb[6].mxu1 }
 0x3fb   :  { %636 = vst.msk [vmem:[#allocation9 + $0x8] sm:$0xff] %vm54_vm0, %v631_v57  ;;  %v763_v58 = vpop.f32.mrb[7].mxu1 }
 0x3fc   :  { %881 = shalt.err (!%p878_p0)
}
 0x3fd   :  { %s882_s27 = scalar_lea.hbm %s1018_s2, 256 }
 0x3fe   :  { %p883_p1 = scmp.ne.s32.totalorder %s1018_s2, %s882_s27  ;;  %p886_p2 = scmp.lt.u32.totalorder %s882_s27, %s1018_s2 }
 0x400   :  { %p888_p3 = pnand %p886_p2, %p883_p1 }
 0x402   :  { %891 = shalt.err (!%p888_p3)
}
 0x403   :  { %650 = dma.vmem_to_hbm [thread:$0]  %s645_s24, 256, %s1018_s2, [#allocation6], %s901_s22, %s901_s22, %s902_s23  }
 0x404   :  { %896 = dma.done.wait [#allocation6], 256  }
 0x405   :  { %897 = vsyncadd [#allocation6], 4294967040 }
 0x406   :  { %898 = dma.done.wait [#allocation11], 256  }
 0x407   :  { %899 = vsyncadd [#allocation11], 4294967040 }
 0x408   :  { %669 = vsyncpa [#allocation5], 1 }
 0x409   :  { %670 = vsyncpa [#allocation8], 1 }
 0x40a   :  { %671 = vsyncpa [#allocation6], 1 }
 0x40b   :  { %672 = vsyncpa [#allocation11], 1 }

</bundles_post_ra>
